<compile_context>
chip_gen: v6e
topology: v6e:2x2x1
jax: 0.10.0
libtpu: 0.0.40
codegen_flags: <defaults>
</compile_context>

<pallas_src>
import functools
import math
import types

import jax
import jax.numpy as jnp
from jax import lax
from jax.experimental import pallas as pl
from jax.experimental.pallas import tpu as pltpu


# ----------------------------------------------------------------------------
# Hardware-aware configuration & tiling helpers
# ----------------------------------------------------------------------------
@functools.lru_cache(maxsize=1)
def _hw_config():
    kind = ""
    try:
        kind = jax.devices()[0].device_kind.lower()
    except Exception:
        pass
    gen = next((g for g in ("v7", "v6", "v5", "v4") if g in kind), None)
    if gen in ("v5", "v6"):
        # 128 MiB physical VMEM: bigger tiles, generous scoped-VMEM cap.
        vmem, tm, tq = 96 << 20, 512, 512
    else:
        # v7x has only 64 MiB VMEM; keep the conservative budget (also default).
        vmem, tm, tq = 32 << 20, 256, 256
    return types.SimpleNamespace(
        generation=gen,
        vmem_limit=vmem,
        tm=tm, tn=256, tk=512,      # GEMM row / col / contraction tiles
        tq=tq, tkv=256,             # flash-attention q / kv tiles
        num_cores=2 if gen == "v7" else 1,
        bf16_eup=gen in ("v6", "v7"),
    )


def _pick_tile(n, target, align):
    """Largest t <= target with n % t == 0 and t % align == 0; else full n."""
    if n <= target:
        return n
    t = (target // align) * align
    while t >= align:
        if n % t == 0:
            return t
        t -= align
    # TODO(synk): pad awkward sizes to the next aligned multiple instead of the
    #             full-dimension fallback (can overflow VMEM for huge odd T).
    return n


def _row_align(dtype):
    return {4: 8, 2: 16, 1: 32}.get(jnp.dtype(dtype).itemsize, 8)


def _split_for_cores(n, tile, align, num_cores):
    """Shrink a row tile so >= num_cores parallel blocks exist (v7x: 2 TCs)."""
    if num_cores <= 1 or tile <= 0 or n // tile >= num_cores:
        return tile
    cand = _pick_tile(n, max(align, n // num_cores), align)
    if cand < tile and n % cand == 0 and n // cand >= num_cores:
        return cand
    return tile


# ----------------------------------------------------------------------------
# In-kernel math helpers
# ----------------------------------------------------------------------------
def _erf_approx(x):
    # Abramowitz & Stegun 7.1.26, |err| <= 1.5e-7; exp/mul/add/where only.
    a1, a2, a3, a4, a5 = (0.254829592, -0.284496736, 1.421413741,
                          -1.453152027, 1.061405429)
    p = 0.3275911
    ax = jnp.abs(x)
    t = 1.0 / (1.0 + p * ax)
    poly = ((((a5 * t + a4) * t + a3) * t + a2) * t + a1) * t
    y = 1.0 - poly * jnp.exp(-ax * ax)
    return jnp.where(x < 0.0, -y, y)


def _gelu_exact(x):
    # Matches torch F.gelu default (erf form), up to ~1e-7.
    return 0.5 * x * (1.0 + _erf_approx(x * (1.0 / math.sqrt(2.0))))


def _layernorm_block(x, g, b, eps):
    xf = x.astype(jnp.float32)
    mu = jnp.mean(xf, axis=-1, keepdims=True)
    xc = xf - mu
    var = jnp.mean(xc * xc, axis=-1, keepdims=True)
    return xc * lax.rsqrt(var + eps) * g.astype(jnp.float32) + b.astype(jnp.float32)


# ----------------------------------------------------------------------------
# Kernels
# ----------------------------------------------------------------------------
def _matmul_kernel(*refs, has_ln, has_bias, has_res, eps):
    """out = [LayerNorm](x) @ w (+bias) (+residual); grid = (rows, cols, K)."""
    x_ref, w_ref = refs[0], refs[1]
    idx = 2
    if has_ln:
        lng_ref, lnb_ref = refs[idx], refs[idx + 1]
        idx += 2
    b_ref = refs[idx] if has_bias else None
    idx += int(has_bias)
    r_ref = refs[idx] if has_res else None
    idx += int(has_res)
    o_ref, acc_ref = refs[idx], refs[idx + 1]

    @pl.when(pl.program_id(2) == 0)
    def _init():
        acc_ref[...] = jnp.zeros_like(acc_ref)

    x = x_ref[...]
    if has_ln:
        # Fused LN: recomputed per output-column block (cheap VPU work, hidden
        # under the MXU) so the normed activation never round-trips HBM.
        x = _layernorm_block(x, lng_ref[...], lnb_ref[...], eps).astype(w_ref.dtype)
    acc_ref[...] += jnp.dot(x, w_ref[...], preferred_element_type=jnp.float32)

    @pl.when(pl.program_id(2) == pl.num_programs(2) - 1)
    def _finish():
        out = acc_ref[...]
        if has_bias:
            out = out + b_ref[...].astype(jnp.float32)
        if has_res:
            out = out + r_ref[...].astype(jnp.float32)
        o_ref[...] = out.astype(o_ref.dtype)


def _geglu_matmul_kernel(*refs, has_bias, has_res, split_inner):
    """out = (a * gelu(g)) @ w (+bias) (+residual); the gated activation is
    computed per K tile in VMEM and never written to HBM."""
    if split_inner is None:
        a_ref, g_ref, w_ref = refs[0], refs[1], refs[2]
        idx = 3
    else:
        h_ref, w_ref = refs[0], refs[1]
        idx = 2
    b_ref = refs[idx] if has_bias else None
    idx += int(has_bias)
    r_ref = refs[idx] if has_res else None
    idx += int(has_res)
    o_ref, acc_ref = refs[idx], refs[idx + 1]

    @pl.when(pl.program_id(2) == 0)
    def _init():
        acc_ref[...] = jnp.zeros_like(acc_ref)

    if split_inner is None:
        a = a_ref[...].astype(jnp.float32)
        g = g_ref[...].astype(jnp.float32)
    else:
        h = h_ref[...].astype(jnp.float32)
        a, g = h[:, :split_inner], h[:, split_inner:]
    x = (a * _gelu_exact(g)).astype(w_ref.dtype)
    acc_ref[...] += jnp.dot(x, w_ref[...], preferred_element_type=jnp.float32)

    @pl.when(pl.program_id(2) == pl.num_programs(2) - 1)
    def _finish():
        out = acc_ref[...]
        if has_bias:
            out = out + b_ref[...].astype(jnp.float32)
        if has_res:
            out = out + r_ref[...].astype(jnp.float32)
        o_ref[...] = out.astype(o_ref.dtype)


def _flash_attn_kernel(q_ref, k_ref, v_ref, o_ref, m_sc, l_sc, acc_sc, *,
                       heads, dim_head, exp_bf16):
    """One (batch, q-tile, kv-tile) grid step; heads packed in the lane dim.

    q_ref: (tq, H*Dh)  k_ref/v_ref: (tk, H*Dh)  o_ref: (tq, H*Dh)
    m_sc/l_sc: (H, tq, 1) f32    acc_sc: (H, tq, Dh) f32
    The 1/sqrt(Dh) softmax scale is folded into the Q projection weights.
    """
    kv_idx = pl.program_id(2)

    @pl.when(kv_idx == 0)
    def _init():
        m_sc[...] = jnp.full_like(m_sc, -jnp.inf)
        l_sc[...] = jnp.zeros_like(l_sc)
        acc_sc[...] = jnp.zeros_like(acc_sc)

    # TODO(synk): switch to lax.fori_loop over heads once dynamic lane-offset
    #             slicing (pl.ds on the minor dim) lowers robustly for Dh < 128;
    #             the per-head temporaries below are consumed inside each
    #             iteration so the static unroll keeps live ranges short.
    for h in range(heads):
        lo = h * dim_head
        q = q_ref[:, lo:lo + dim_head]
        k = k_ref[:, lo:lo + dim_head]
        v = v_ref[:, lo:lo + dim_head]
        # Contract the last dims directly (no k transpose); f32 MXU accumulation.
        s = lax.dot_general(q, k, (((1,), (1,)), ((), ())),
                            preferred_element_type=jnp.float32)        # (tq, tk)
        m_prev = m_sc[h]
        m_new = jnp.maximum(m_prev, jnp.max(s, axis=-1, keepdims=True))
        alpha = jnp.exp(m_prev - m_new)
        if exp_bf16:
            # bf16 EUP (v6e/v7x): ~2x exp throughput; p is handed to the PV
            # matmul already in bf16 while l/acc stay f32.
            p = jnp.exp((s - m_new).astype(jnp.bfloat16))
            l_sc[h] = alpha * l_sc[h] + jnp.sum(p.astype(jnp.float32),
                                                axis=-1, keepdims=True)
            pv = lax.dot_general(p, v, (((1,), (0,)), ((), ())),
                                 preferred_element_type=jnp.float32)   # (tq, Dh)
        else:
            p = jnp.exp(s - m_new)
            l_sc[h] = alpha * l_sc[h] + jnp.sum(p, axis=-1, keepdims=True)
            pv = lax.dot_general(p.astype(v.dtype), v, (((1,), (0,)), ((), ())),
                                 preferred_element_type=jnp.float32)
        acc_sc[h] = alpha * acc_sc[h] + pv
        m_sc[h] = m_new

    @pl.when(kv_idx == pl.num_programs(2) - 1)
    def _finalize():
        # Assemble all heads in-register and emit ONE lane-dense store
        # (avoids H sub-128-lane masked vst in the epilogue).
        outs = []
        for h in range(heads):
            l = l_sc[h]
            inv = pl.reciprocal(l, approx=True)        # EUP slot
            inv = inv * (2.0 - l * inv)                # one Newton step
            outs.append(acc_sc[h] * inv)
        o_ref[...] = jnp.concatenate(outs, axis=-1).astype(o_ref.dtype)


# ----------------------------------------------------------------------------
# pallas_call wrappers
# ----------------------------------------------------------------------------
def pallas_linear(x2d, w, b=None, residual=None, *, ln=None, eps=1e-5, cfg=None):
    """y = [LayerNorm](x2d) @ w (+b) (+residual), tiled (rows, cols, K)."""
    cfg = cfg or _hw_config()
    T, Cin = x2d.shape
    Cout = w.shape[1]
    ralign = _row_align(x2d.dtype)
    tm_ = _pick_tile(T, cfg.tm, ralign)
    tn_ = _pick_tile(Cout, cfg.tn, 128)
    if ln is not None:
        tk_ = Cin                      # LN needs the full feature row per block
        while tm_ > ralign and tm_ * Cin * x2d.dtype.itemsize > (8 << 20):
            nt = _pick_tile(T, tm_ // 2, ralign)
            if nt >= tm_:
                break
            tm_ = nt
    else:
        tk_ = _pick_tile(Cin, cfg.tk, 128)
    if cfg.num_cores > 1 and (T // tm_) * (Cout // tn_) < cfg.num_cores:
        tm_ = _split_for_cores(T, tm_, ralign, cfg.num_cores)
    grid = (T // tm_, Cout // tn_, Cin // tk_)

    in_specs = [pl.BlockSpec((tm_, tk_), lambda i, j, k: (i, k)),
                pl.BlockSpec((tk_, tn_), lambda i, j, k: (k, j))]
    args = [x2d, w]
    if ln is not None:
        gamma, beta = ln
        in_specs += [pl.BlockSpec((1, Cin), lambda i, j, k: (0, 0)),
                     pl.BlockSpec((1, Cin), lambda i, j, k: (0, 0))]
        args += [gamma.reshape(1, Cin), beta.reshape(1, Cin)]
    if b is not None:
        in_specs.append(pl.BlockSpec((1, tn_), lambda i, j, k: (0, j)))
        args.append(b.reshape(1, Cout))
    if residual is not None:
        in_specs.append(pl.BlockSpec((tm_, tn_), lambda i, j, k: (i, j)))
        args.append(residual)

    itemsize = x2d.dtype.itemsize
    flops = 2 * T * Cin * Cout
    bytes_acc = int(itemsize * (T * Cin + Cin * Cout + 2 * T * Cout))
    return pl.pallas_call(
        functools.partial(_matmul_kernel, has_ln=ln is not None,
                          has_bias=b is not None, has_res=residual is not None,
                          eps=eps),
        out_shape=jax.ShapeDtypeStruct((T, Cout), x2d.dtype),
        grid=grid,
        in_specs=in_specs,
        out_specs=pl.BlockSpec((tm_, tn_), lambda i, j, k: (i, j)),
        scratch_shapes=[pltpu.VMEM((tm_, tn_), jnp.float32)],
        compiler_params=pltpu.CompilerParams(
            dimension_semantics=("parallel", "parallel", "arbitrary"),
            vmem_limit_bytes=cfg.vmem_limit),
        cost_estimate=pl.CostEstimate(flops=int(flops), transcendentals=0,
                                      bytes_accessed=bytes_acc),
    )(*args)


def pallas_geglu_linear(hp, inner, w, b=None, residual=None, *, cfg=None):
    """y = (hp[:, :inner] * gelu(hp[:, inner:])) @ w (+b) (+residual)."""
    cfg = cfg or _hw_config()
    T = hp.shape[0]
    Cout = w.shape[1]
    ralign = _row_align(hp.dtype)
    tm_ = _pick_tile(T, cfg.tm, ralign)
    tn_ = _pick_tile(Cout, cfg.tn, 128)
    if cfg.num_cores > 1 and (T // tm_) * (Cout // tn_) < cfg.num_cores:
        tm_ = _split_for_cores(T, tm_, ralign, cfg.num_cores)

    split_inner = None
    if inner % 128 == 0:
        tk_ = _pick_tile(inner, cfg.tk, 128)
        ncol = inner // tk_
        in_specs = [pl.BlockSpec((tm_, tk_), lambda i, j, k: (i, k)),
                    pl.BlockSpec((tm_, tk_), lambda i, j, k: (i, k + ncol)),
                    pl.BlockSpec((tk_, tn_), lambda i, j, k: (k, j))]
        args = [hp, hp, w]
    else:
        # Non-128-aligned inner: single full-width hp block, split in-kernel.
        tk_ = inner
        split_inner = inner
        in_specs = [pl.BlockSpec((tm_, 2 * inner), lambda i, j, k: (i, 0)),
                    pl.BlockSpec((tk_, tn_), lambda i, j, k: (k, j))]
        args = [hp, w]
    grid = (T // tm_, Cout // tn_, inner // tk_)

    if b is not None:
        in_specs.append(pl.BlockSpec((1, tn_), lambda i, j, k: (0, j)))
        args.append(b.reshape(1, Cout))
    if residual is not None:
        in_specs.append(pl.BlockSpec((tm_, tn_), lambda i, j, k: (i, j)))
        args.append(residual)

    itemsize = hp.dtype.itemsize
    flops = 2 * T * inner * Cout
    bytes_acc = int(itemsize * (2 * T * inner + inner * Cout + 2 * T * Cout))
    return pl.pallas_call(
        functools.partial(_geglu_matmul_kernel, has_bias=b is not None,
                          has_res=residual is not None, split_inner=split_inner),
        out_shape=jax.ShapeDtypeStruct((T, Cout), hp.dtype),
        grid=grid,
        in_specs=in_specs,
        out_specs=pl.BlockSpec((tm_, tn_), lambda i, j, k: (i, j)),
        scratch_shapes=[pltpu.VMEM((tm_, tn_), jnp.float32)],
        compiler_params=pltpu.CompilerParams(
            dimension_semantics=("parallel", "parallel", "arbitrary"),
            vmem_limit_bytes=cfg.vmem_limit),
        cost_estimate=pl.CostEstimate(
            flops=int(flops),
            transcendentals=int(T * inner * max(1, Cout // tn_)),
            bytes_accessed=bytes_acc),
    )(*args)


def flash_attention(q_src, k_src, v_src, *, heads, dim_head,
                    q_blk=0, k_blk=0, v_blk=0, cfg=None):
    """q_src: (B, N, *), k_src/v_src: (B, M, *).

    Column-block indices (q_blk/k_blk/v_blk) address fused QKV / KV activations
    in place (no slicing copies). Output: (B, N, heads*dim_head), merged heads.
    """
    cfg = cfg or _hw_config()
    B, N, _ = q_src.shape
    M = k_src.shape[1]
    inner = heads * dim_head
    ralign = _row_align(q_src.dtype)
    tq_ = _pick_tile(N, cfg.tq, ralign)
    if cfg.num_cores > 1 and B * (N // tq_) < cfg.num_cores:
        tq_ = _split_for_cores(N, tq_, ralign, cfg.num_cores)
    tk_ = _pick_tile(M, cfg.tkv, ralign)
    grid = (B, N // tq_, M // tk_)
    exp_bf16 = bool(cfg.bf16_eup and q_src.dtype == jnp.bfloat16)

    itemsize = q_src.dtype.itemsize
    flops = 4 * B * heads * N * M * dim_head
    bytes_acc = int(itemsize * (2 * B * N * inner + 2 * B * M * inner))

    return pl.pallas_call(
        functools.partial(_flash_attn_kernel, heads=heads, dim_head=dim_head,
                          exp_bf16=exp_bf16),
        out_shape=jax.ShapeDtypeStruct((B, N, inner), q_src.dtype),
        grid=grid,
        in_specs=[
            pl.BlockSpec((None, tq_, inner), lambda b, qi, ki: (b, qi, q_blk)),
            pl.BlockSpec((None, tk_, inner), lambda b, qi, ki: (b, ki, k_blk)),
            pl.BlockSpec((None, tk_, inner), lambda b, qi, ki: (b, ki, v_blk)),
        ],
        out_specs=pl.BlockSpec((None, tq_, inner), lambda b, qi, ki: (b, qi, 0)),
        scratch_shapes=[
            pltpu.VMEM((heads, tq_, 1), jnp.float32),          # running max
            pltpu.VMEM((heads, tq_, 1), jnp.float32),          # running denom
            pltpu.VMEM((heads, tq_, dim_head), jnp.float32),   # f32 accumulator
        ],
        compiler_params=pltpu.CompilerParams(
            dimension_semantics=("parallel", "parallel", "arbitrary"),
            vmem_limit_bytes=cfg.vmem_limit),
        cost_estimate=pl.CostEstimate(flops=int(flops),
                                      transcendentals=int(B * heads * N * M),
                                      bytes_accessed=bytes_acc),
    )(q_src, k_src, v_src)


# ----------------------------------------------------------------------------
# Module-equivalent forward
# ----------------------------------------------------------------------------
def cross_attention(p, x2, B, N, context, *, residual, ln, heads, dim_head, cfg):
    """MemoryEfficientCrossAttention (+ fused pre-LayerNorm and residual add).

    x2: (B*N, q_dim) un-normed input; `ln` = (gamma, beta) of the preceding
    LayerNorm (fused into the q/k/v projections). context: (B, M, c_dim) or None.
    residual: (B*N, q_dim). Returns (B*N, q_dim).
    """
    inner = heads * dim_head
    if context is None:
        c2, M, ctx_ln = x2, N, ln
    else:
        M = context.shape[1]
        c2, ctx_ln = context.reshape(B * M, context.shape[-1]), None

    if "wqkv" in p and context is None:        # fused QKV (self-attention)
        qkv = pallas_linear(x2, p["wqkv"], ln=ln, cfg=cfg).reshape(B, N, 3 * inner)
        o = flash_attention(qkv, qkv, qkv, heads=heads, dim_head=dim_head,
                            q_blk=0, k_blk=1, v_blk=2, cfg=cfg)
    elif "wkv" in p:                           # fused KV (cross-attention)
        q = pallas_linear(x2, p["wq"], ln=ln, cfg=cfg).reshape(B, N, inner)
        kv = pallas_linear(c2, p["wkv"], ln=ctx_ln, cfg=cfg).reshape(B, M, 2 * inner)
        o = flash_attention(q, kv, kv, heads=heads, dim_head=dim_head,
                            q_blk=0, k_blk=0, v_blk=1, cfg=cfg)
    else:                                      # separate projections
        q = pallas_linear(x2, p["wq"], ln=ln, cfg=cfg).reshape(B, N, inner)
        k = pallas_linear(c2, p["wk"], ln=ctx_ln, cfg=cfg).reshape(B, M, inner)
        v = pallas_linear(c2, p["wv"], ln=ctx_ln, cfg=cfg).reshape(B, M, inner)
        o = flash_attention(q, k, v, heads=heads, dim_head=dim_head, cfg=cfg)

    # to_out: Linear(+bias) with the residual add fused; Dropout is identity.
    return pallas_linear(o.reshape(B * N, inner), p["wo"], p["bo"],
                         residual=residual, cfg=cfg)


def basic_transformer_block(params, x, context=None, *, heads, dim_head,
                            disable_self_attn=False):
    """BasicTransformerBlock forward (eval). `params` must come from prepare_params."""
    cfg = _hw_config()
    B, N, dim = x.shape
    x2 = x.reshape(B * N, dim)

    # attn1 (self unless disable_self_attn) + residual; norm1 fused into q/k/v.
    a1_ctx = context if disable_self_attn else None
    x2 = cross_attention(params["attn1"], x2, B, N, a1_ctx, residual=x2,
                         ln=(params["norm1_g"], params["norm1_b"]),
                         heads=heads, dim_head=dim_head, cfg=cfg)

    # attn2 (cross) + residual; norm2 fused into the q projection.
    x2 = cross_attention(params["attn2"], x2, B, N, context, residual=x2,
                         ln=(params["norm2_g"], params["norm2_b"]),
                         heads=heads, dim_head=dim_head, cfg=cfg)

    # FeedForward: norm3 fused into ff_w1; GEGLU + residual fused into ff_w2.
    inner_ff = params["ff_w2"].shape[0]
    hp = pallas_linear(x2, params["ff_w1"], params["ff_b1"],
                       ln=(params["norm3_g"], params["norm3_b"]), cfg=cfg)
    x2 = pallas_geglu_linear(hp, inner_ff, params["ff_w2"], params["ff_b2"],
                             residual=x2, cfg=cfg)
    return x2.reshape(B, N, dim)


# ----------------------------------------------------------------------------
# Parameters & pure-JAX reference
# ----------------------------------------------------------------------------
def prepare_params(params, heads, dim_head, disable_self_attn=False):
    """One-time weight prep: fold softmax scale into wq and pre-concatenate the
    fused QKV / KV projection weights (no per-forward concatenate)."""
    inner = heads * dim_head
    fuse = (inner % 128) == 0

    def scale_wq(wq):
        return (wq.astype(jnp.float32) * (dim_head ** -0.5)).astype(wq.dtype)

    def prep_attn(p, self_attn):
        wq = scale_wq(p["wq"])
        out = {"wo": p["wo"], "bo": p["bo"]}
        if fuse and self_attn:
            out["wqkv"] = jnp.concatenate([wq, p["wk"], p["wv"]], axis=1)
        elif fuse:
            out["wq"] = wq
            out["wkv"] = jnp.concatenate([p["wk"], p["wv"]], axis=1)
        else:
            out["wq"], out["wk"], out["wv"] = wq, p["wk"], p["wv"]
        return out

    new = dict(params)
    new["attn1"] = prep_attn(params["attn1"], self_attn=not disable_self_attn)
    new["attn2"] = prep_attn(params["attn2"], self_attn=False)
    return new


def init_params(key, dim, context_dim, heads, dim_head, ff_mult=4,
                dtype=jnp.float32):
    inner = heads * dim_head
    inner_ff = dim * ff_mult
    keys = iter(jax.random.split(key, 24))

    def lin_w(fan_in, fan_out):
        bound = 1.0 / math.sqrt(fan_in)
        w = jax.random.uniform(next(keys), (fan_in, fan_out), jnp.float32,
                               -bound, bound)
        return w.astype(dtype)

    def lin_b(fan_in, fan_out):
        bound = 1.0 / math.sqrt(fan_in)
        b = jax.random.uniform(next(keys), (fan_out,), jnp.float32, -bound, bound)
        return b.astype(dtype)

    def attn_p(q_dim, c_dim):
        return {"wq": lin_w(q_dim, inner), "wk": lin_w(c_dim, inner),
                "wv": lin_w(c_dim, inner), "wo": lin_w(inner, q_dim),
                "bo": lin_b(inner, q_dim)}

    params = {
        "attn1": attn_p(dim, dim),            # self-attention (context_dim=None)
        "attn2": attn_p(dim, context_dim),
        "ff_w1": lin_w(dim, 2 * inner_ff),
        "ff_b1": lin_b(dim, 2 * inner_ff),
        "ff_w2": lin_w(inner_ff, dim),
        "ff_b2": lin_b(inner_ff, dim),
    }
    for i in (1, 2, 3):
        g = 1.0 + 0.05 * jax.random.normal(next(keys), (dim,), jnp.float32)
        b = 0.05 * jax.random.normal(next(keys), (dim,), jnp.float32)
        params[f"norm{i}_g"] = g.astype(dtype)
        params[f"norm{i}_b"] = b.astype(dtype)
    return params


def reference_block(params, x, context=None, *, heads, dim_head,
                    disable_self_attn=False, eps=1e-5):
    def ln(t, g, b):
        mu = jnp.mean(t, axis=-1, keepdims=True)
        var = jnp.mean((t - mu) ** 2, axis=-1, keepdims=True)
        return (t - mu) / jnp.sqrt(var + eps) * g + b

    def attn(p, xq, ctx):
        B, N, _ = xq.shape
        M = ctx.shape[1]
        q, k, v = xq @ p["wq"], ctx @ p["wk"], ctx @ p["wv"]

        def sh(t, L):
            return t.reshape(B, L, heads, dim_head).transpose(0, 2, 1, 3)

        qh, kh, vh = sh(q, N), sh(k, M), sh(v, M)
        s = jnp.einsum("bhnd,bhmd->bhnm", qh, kh) / math.sqrt(dim_head)
        pr = jax.nn.softmax(s, axis=-1)
        o = jnp.einsum("bhnm,bhmd->bhnd", pr, vh)
        o = o.transpose(0, 2, 1, 3).reshape(B, N, heads * dim_head)
        return o @ p["wo"] + p["bo"]

    h = ln(x, params["norm1_g"], params["norm1_b"])
    a1_ctx = context if (disable_self_attn and context is not None) else h
    x = attn(params["attn1"], h, a1_ctx) + x
    h = ln(x, params["norm2_g"], params["norm2_b"])
    x = attn(params["attn2"], h, context if context is not None else h) + x
    h = ln(x, params["norm3_g"], params["norm3_b"])
    inner_ff = params["ff_w2"].shape[0]
    hp = h @ params["ff_w1"] + params["ff_b1"]
    y = hp[..., :inner_ff] * jax.nn.gelu(hp[..., inner_ff:], approximate=False)
    return y @ params["ff_w2"] + params["ff_b2"] + x


# ----------------------------------------------------------------------------
# Test
# ----------------------------------------------------------------------------
if __name__ == "__main__":
    key = jax.random.PRNGKey(0)
    kp, kx, kc = jax.random.split(key, 3)

    # Config 1: tiny, non-128-aligned head width (separate q/k/v, LN fused).
    B, N, M = 2, 16, 8
    heads, dim_head = 4, 8
    dim, context_dim = 32, 24
    raw = init_params(kp, dim, context_dim, heads, dim_head)
    prm = prepare_params(raw, heads, dim_head)
    x = jax.random.normal(kx, (B, N, dim), jnp.float32)
    context = jax.random.normal(kc, (B, M, context_dim), jnp.float32)
    out = basic_transformer_block(prm, x, context, heads=heads, dim_head=dim_head)
    out = jax.block_until_ready(out)
    ref = reference_block(raw, x, context, heads=heads, dim_head=dim_head)
    assert out.shape == (B, N, dim), out.shape
    err = float(jnp.max(jnp.abs(out - ref)))
    assert jnp.allclose(out, ref, atol=2e-4, rtol=2e-4), f"config1 mismatch: {err}"

    # Config 2: 128-aligned head width -> fused QKV / KV + lane-dense path.
    heads2, dim_head2, dim2, ctx_dim2 = 2, 64, 128, 96
    raw2 = init_params(jax.random.PRNGKey(1), dim2, ctx_dim2, heads2, dim_head2)
    prm2 = prepare_params(raw2, heads2, dim_head2)
    x2 = jax.random.normal(jax.random.PRNGKey(2), (B, N, dim2), jnp.float32)
    ctx2 = jax.random.normal(jax.random.PRNGKey(3), (B, M, ctx_dim2), jnp.float32)
    out2 = basic_transformer_block(prm2, x2, ctx2, heads=heads2, dim_head=dim_head2)
    out2 = jax.block_until_ready(out2)
    ref2 = reference_block(raw2, x2, ctx2, heads=heads2, dim_head=dim_head2)
    err2 = float(jnp.max(jnp.abs(out2 - ref2)))
    assert jnp.allclose(out2, ref2, atol=2e-4, rtol=2e-4), f"config2 mismatch: {err2}"

    # Config 3: bf16 activations + weights (bf16 MXU operands, f32 accumulation;
    # bf16 softmax exp on v6e/v7x). Checked loosely against an f32 reference.
    heads3, dim_head3, dim3, ctx_dim3 = 4, 32, 128, 96
    raw3 = init_params(jax.random.PRNGKey(4), dim3, ctx_dim3, heads3, dim_head3,
                       dtype=jnp.bfloat16)
    prm3 = prepare_params(raw3, heads3, dim_head3)
    x3 = jax.random.normal(jax.random.PRNGKey(5), (B, N, dim3),
                           jnp.float32).astype(jnp.bfloat16)
    ctx3 = jax.random.normal(jax.random.PRNGKey(6), (B, M, ctx_dim3),
                             jnp.float32).astype(jnp.bfloat16)
    out3 = basic_transformer_block(prm3, x3, ctx3, heads=heads3, dim_head=dim_head3)
    out3 = jax.block_until_ready(out3)
    raw3_f32 = jax.tree_util.tree_map(lambda a: a.astype(jnp.float32), raw3)
    ref3 = reference_block(raw3_f32, x3.astype(jnp.float32),
                           ctx3.astype(jnp.float32),
                           heads=heads3, dim_head=dim_head3)
    diff3 = jnp.abs(out3.astype(jnp.float32) - ref3)
    err3 = float(jnp.max(diff3))
    assert out3.dtype == jnp.bfloat16, out3.dtype
    assert bool(jnp.all(jnp.isfinite(diff3))) and err3 < 0.5, f"config3 mismatch: {err3}"

    print("KERNEL_OK")
</pallas_src>

<mosaic_0001>
module attributes {stable_mosaic.version = 11 : i64} {
  func.func @_matmul_kernel(%arg0: i32, %arg1: i32, %arg2: i32, %arg3: memref<32x32xf32, #tpu.memory_space<vmem>>, %arg4: memref<32x32xf32, #tpu.memory_space<vmem>>, %arg5: memref<1x32xf32, #tpu.memory_space<vmem>>, %arg6: memref<1x32xf32, #tpu.memory_space<vmem>>, %arg7: memref<32x32xf32, #tpu.memory_space<vmem>>, %arg8: memref<32x32xf32, #tpu.memory_space<vmem>>) attributes {dimension_semantics = [#tpu.dimension_semantics<parallel>, #tpu.dimension_semantics<parallel>, #tpu.dimension_semantics<arbitrary>], iteration_bounds = array<i64: 1, 1, 1>, scalar_prefetch = 0 : i64, scratch_operands = 1 : i64, tpu.core_type = #tpu.core_type<tc>, window_params = [{transform_indices = @transform_0, window_bounds = array<i64: 32, 32>}, {transform_indices = @transform_1, window_bounds = array<i64: 32, 32>}, {pipeline_mode = #tpu.pipeline_mode<synchronous>, transform_indices = @transform_2, window_bounds = array<i64: 1, 32>}, {pipeline_mode = #tpu.pipeline_mode<synchronous>, transform_indices = @transform_3, window_bounds = array<i64: 1, 32>}, {transform_indices = @transform_4, window_bounds = array<i64: 32, 32>}]} {
    %c0_i32 = arith.constant 0 : i32
    %0 = arith.cmpi eq, %arg2, %c0_i32 : i32
    %1 = arith.extui %0 : i1 to i32
    %c0_i32_0 = arith.constant 0 : i32
    %2 = arith.cmpi ne, %1, %c0_i32_0 : i32
    scf.if %2 {
      %cst_19 = arith.constant 0.000000e+00 : f32
      %34 = vector.broadcast %cst_19 : f32 to vector<32x32xf32>
      %c0_20 = arith.constant 0 : index
      %c0_21 = arith.constant 0 : index
      %35 = vector.load %arg8[%c0_20, %c0_21] : memref<32x32xf32, #tpu.memory_space<vmem>>, vector<32x32xf32>
      tpu.vector_store %arg8[%c0_20, %c0_21], %34 {strides = array<i32>} : memref<32x32xf32, #tpu.memory_space<vmem>>, vector<32x32xf32>,
    } else {
    }
    %c0 = arith.constant 0 : index
    %c0_1 = arith.constant 0 : index
    %3 = vector.load %arg3[%c0, %c0_1] : memref<32x32xf32, #tpu.memory_space<vmem>>, vector<32x32xf32>
    %c0_2 = arith.constant 0 : index
    %c0_3 = arith.constant 0 : index
    %4 = vector.load %arg5[%c0_2, %c0_3] : memref<1x32xf32, #tpu.memory_space<vmem>>, vector<1x32xf32>
    %c0_4 = arith.constant 0 : index
    %c0_5 = arith.constant 0 : index
    %5 = vector.load %arg6[%c0_4, %c0_5] : memref<1x32xf32, #tpu.memory_space<vmem>>, vector<1x32xf32>
    %cst = arith.constant dense<0.000000e+00> : vector<32xf32>
    %6 = vector.multi_reduction <add>, %3, %cst [1] : vector<32x32xf32> to vector<32xf32>
    %7 = vector.shape_cast %6 : vector<32xf32> to vector<32x1xf32>
    %cst_6 = arith.constant 3.200000e+01 : f32
    %8 = vector.broadcast %cst_6 : f32 to vector<32x1xf32>
    %9 = arith.divf %7, %8 : vector<32x1xf32>
    %10 = vector.broadcast %9 : vector<32x1xf32> to vector<32x32xf32>
    %11 = arith.subf %3, %10 : vector<32x32xf32>
    %12 = arith.mulf %11, %11 : vector<32x32xf32>
    %cst_7 = arith.constant dense<0.000000e+00> : vector<32xf32>
    %13 = vector.multi_reduction <add>, %12, %cst_7 [1] : vector<32x32xf32> to vector<32xf32>
    %14 = vector.shape_cast %13 : vector<32xf32> to vector<32x1xf32>
    %cst_8 = arith.constant 3.200000e+01 : f32
    %15 = vector.broadcast %cst_8 : f32 to vector<32x1xf32>
    %16 = arith.divf %14, %15 : vector<32x1xf32>
    %cst_9 = arith.constant 9.99999974E-6 : f32
    %17 = vector.broadcast %cst_9 : f32 to vector<32x1xf32>
    %18 = arith.addf %16, %17 : vector<32x1xf32>
    %19 = math.rsqrt %18 : vector<32x1xf32>
    %20 = vector.broadcast %19 : vector<32x1xf32> to vector<32x32xf32>
    %21 = arith.mulf %11, %20 : vector<32x32xf32>
    %22 = vector.broadcast %4 : vector<1x32xf32> to vector<32x32xf32>
    %23 = arith.mulf %21, %22 : vector<32x32xf32>
    %24 = vector.broadcast %5 : vector<1x32xf32> to vector<32x32xf32>
    %25 = arith.addf %23, %24 : vector<32x32xf32>
    %c0_10 = arith.constant 0 : index
    %c0_11 = arith.constant 0 : index
    %26 = vector.load %arg8[%c0_10, %c0_11] : memref<32x32xf32, #tpu.memory_space<vmem>>, vector<32x32xf32>
    %c0_12 = arith.constant 0 : index
    %c0_13 = arith.constant 0 : index
    %27 = vector.load %arg4[%c0_12, %c0_13] : memref<32x32xf32, #tpu.memory_space<vmem>>, vector<32x32xf32>
    %cst_14 = arith.constant dense<0.000000e+00> : vector<32x32xf32>
    %28 = tpu.matmul %25, %27, %cst_14 {dimension_numbers = #tpu.dot_dimension_numbers<[1], [0], [0], [1], [0, 0, 1, 1], [], []>} : vector<32x32xf32>, vector<32x32xf32>, vector<32x32xf32> -> vector<32x32xf32>
    %29 = arith.addf %26, %28 : vector<32x32xf32>
    %c0_15 = arith.constant 0 : index
    %c0_16 = arith.constant 0 : index
    %30 = vector.load %arg8[%c0_15, %c0_16] : memref<32x32xf32, #tpu.memory_space<vmem>>, vector<32x32xf32>
    tpu.vector_store %arg8[%c0_15, %c0_16], %29 {strides = array<i32>} : memref<32x32xf32, #tpu.memory_space<vmem>>, vector<32x32xf32>,
    %c0_i32_17 = arith.constant 0 : i32
    %31 = arith.cmpi eq, %arg2, %c0_i32_17 : i32
    %32 = arith.extui %31 : i1 to i32
    %c0_i32_18 = arith.constant 0 : i32
    %33 = arith.cmpi ne, %32, %c0_i32_18 : i32
    scf.if %33 {
      %c0_19 = arith.constant 0 : index
      %c0_20 = arith.constant 0 : index
      %34 = vector.load %arg8[%c0_19, %c0_20] : memref<32x32xf32, #tpu.memory_space<vmem>>, vector<32x32xf32>
      %c0_21 = arith.constant 0 : index
      %c0_22 = arith.constant 0 : index
      %35 = vector.load %arg7[%c0_21, %c0_22] : memref<32x32xf32, #tpu.memory_space<vmem>>, vector<32x32xf32>
      tpu.vector_store %arg7[%c0_21, %c0_22], %34 {strides = array<i32>} : memref<32x32xf32, #tpu.memory_space<vmem>>, vector<32x32xf32>,
    } else {
    }
    return
  }
  func.func @transform_0(%arg0: i32, %arg1: i32, %arg2: i32) -> (i32, i32) {
    %c0_i32 = arith.constant 0 : i32
    return %arg0, %arg2 : i32, i32
  }
  func.func @transform_1(%arg0: i32, %arg1: i32, %arg2: i32) -> (i32, i32) {
    %c0_i32 = arith.constant 0 : i32
    return %arg2, %arg1 : i32, i32
  }
  func.func @transform_2(%arg0: i32, %arg1: i32, %arg2: i32) -> (i32, i32) {
    %c0_i32 = arith.constant 0 : i32
    %c0_i32_0 = arith.constant 0 : i32
    %c0_i32_1 = arith.constant 0 : i32
    return %c0_i32, %c0_i32_0 : i32, i32
  }
  func.func @transform_3(%arg0: i32, %arg1: i32, %arg2: i32) -> (i32, i32) {
    %c0_i32 = arith.constant 0 : i32
    %c0_i32_0 = arith.constant 0 : i32
    %c0_i32_1 = arith.constant 0 : i32
    return %c0_i32, %c0_i32_0 : i32, i32
  }
  func.func @transform_4(%arg0: i32, %arg1: i32, %arg2: i32) -> (i32, i32) {
    %c0_i32 = arith.constant 0 : i32
    return %arg0, %arg1 : i32, i32
  }
}

</mosaic_0001>

<bundles_post_ra>
// kernel: tpu_custom_call.1
= control target key start
LH: loop header
LB: loop body
LE: loop exit
PB: predicated region body
PF: predicated region fallthrough
CT: control target
= control target key end

     0   :  { %9 = vsyncpa [#allocation4], 0  ;;  %s487_s0 = inlined_call_operand.hbm [shape: f32[32,32], index: 0, kind: input, shape index: {}]   ;;  %s488_s1 = inlined_call_operand.hbm [shape: f32[32,32], index: 1, kind: input, shape index: {}]   ;;  %s489_s2 = inlined_call_operand.vmem [shape: f32[1,32], index: 2, kind: input, shape index: {}]   ;;  %s490_s3 = inlined_call_operand.vmem [shape: f32[1,32], index: 3, kind: input, shape index: {}]   ;;  %s491_s4 = inlined_call_operand.hbm [shape: f32[32,32], index: 4, kind: output, shape index: {}]  }
   0x1   :  { %10 = vsyncpa [#allocation7], 0 }
   0x2   :  { %11 = vsyncpa [#allocation5], 0  ;;  %s393_s15 = smov [#allocation3]  }
   0x3   :  { %s17_s16 = sshll.u32 %s393_s15, 4  ;;  %s18_s16 = int_to_ptr.vmem [resolvable:$true] %s17_s16 }
   0x4   :  { %s335_s17 = scalar_lea.vmem %s18_s16, 512  ;;  %p340_p1 = scmp.lt.s32.totalorder %s18_s16, %s18_s16 }
   0x5   :  { %p336_p0 = scmp.ne.s32.totalorder %s18_s16, %s335_s17  ;;  %p341_p2 = scmp.lt.s32.totalorder %s335_s17, %s335_s17 }
   0x7   :  { %p342_p3 = por %p341_p2, %p340_p1 }
   0x9   :  { %p343_p4 = pnand %p342_p3, %p336_p0 }
   0xb   :  { %346 = shalt.err (!%p343_p4)
}
   0xc   :  { %s394_s18 = smov 128   ;;  %s395_s19 = smov 8  }
   0xd   :  { %23 = dma.hbm_to_vmem [thread:$0]  %s487_s0, 512, %s18_s16, [#allocation4], %s394_s18, %s394_s18, %s395_s19  }
   0xe   :  { %s396_s22 = smov [#allocation6]  }
   0xf   :  { %s29_s23 = sshll.u32 %s396_s22, 4  ;;  %s30_s23 = int_to_ptr.vmem [resolvable:$true] %s29_s23 }
  0x10   :  { %s355_s24 = scalar_lea.vmem %s30_s23, 512  ;;  %p360_p6 = scmp.lt.s32.totalorder %s30_s23, %s30_s23 }
  0x11   :  { %p356_p5 = scmp.ne.s32.totalorder %s30_s23, %s355_s24  ;;  %p361_p7 = scmp.lt.s32.totalorder %s355_s24, %s355_s24 }
  0x13   :  { %p362_p8 = por %p361_p7, %p360_p6 }
  0x15   :  { %p363_p9 = pnand %p362_p8, %p356_p5 }
  0x17   :  { %366 = shalt.err (!%p363_p9)
}
  0x18   :  { %35 = dma.hbm_to_vmem [thread:$0]  %s488_s1, 512, %s30_s23, [#allocation7], %s394_s18, %s394_s18, %s395_s19  }
  0x19   :  { %387 = dma.done.wait [#allocation4], 512  }
  0x1a   :  { %388 = vsyncadd [#allocation4], 4294966784 }
  0x1b   :  { %389 = dma.done.wait [#allocation7], 512  }
  0x1c   :  { %390 = vsyncadd [#allocation7], 4294966784  ;;  %vm50_vm0 = vcmask 261120   ;;  %v55_v0 = vld [vmem:[#allocation3] sm:$0xff]  ;;  %v56_v1 = vld [vmem:[#allocation3 + $0x8] sm:$0xff]  ;;  %v397_v32 = vmov 0.0  }
  0x1d   :  { %v57_v2 = vld [vmem:[#allocation3 + $0x10] sm:$0xff]  ;;  %v62_v3 = vsel %vm50_vm0, %v55_v0, 0.0  ;;  %v65_v4 = vsel %vm50_vm0, %v56_v1, 0.0  ;;  %v58_v5 = vld [vmem:[#allocation3 + $0x18] sm:$0xff]  ;;  %v140_v30 = vld [vmem:[#allocation6 + $0x8] sm:$0xff]  ;;  %52 = vst.msk [vmem:[#allocation2 + $0x8] sm:$0xff] %vm50_vm0, %v397_v32 }
  0x1e   :  { %63 = vadd.xlane.f32.xlu0 %v62_v3  ;;  %66 = vadd.xlane.f32.xlu1 %v65_v4  ;;  %v68_v6 = vsel %vm50_vm0, %v57_v2, 0.0  ;;  %v71_v7 = vsel %vm50_vm0, %v58_v5, 0.0  ;;  %v142_v28 = vld [vmem:[#allocation6 + $0x18] sm:$0xff]  ;;  %v141_v29 = vld [vmem:[#allocation6 + $0x10] sm:$0xff]  ;;  %v139_v31 = vld [vmem:[#allocation6] sm:$0xff]  ;;  %51 = vst.msk [vmem:[#allocation2] sm:$0xff] %vm50_vm0, %v397_v32 }
  0x1f   :  { %291 = vmatprep.subr.mxu0 %v142_v28  ;;  %305 = vmatprep.subr.mxu1 %v142_v28  ;;  %53 = vst.msk [vmem:[#allocation2 + $0x10] sm:$0xff] %vm50_vm0, %v397_v32  ;;  %54 = vst.msk [vmem:[#allocation2 + $0x18] sm:$0xff] %vm50_vm0, %v397_v32  ;;  %v277_v46 = vld [vmem:[%s489_s2] ss:$0 sm:$0xff]  ;;  %s398_s2 = smov [#allocation8]  }
  0x20   :  { %292 = vmatpush3.msra.mxu0 %v142_v28  ;;  %309 = vmatpush3.msra.mxu1 %v142_v28  ;;  %v278_v48 = vld [vmem:[%s490_s3] ss:$0 sm:$0xff]  ;;  %s264_s3 = sshll.u32 %s398_s2, 4  ;;  %s265_s3 = int_to_ptr.vmem [resolvable:$true] %s264_s3 }
  0x21   :  { %293 = vmatprep.subr.mxu0 %v141_v29  ;;  %306 = vmatprep.subr.mxu1 %v141_v29  ;;  %s367_s29 = scalar_lea.vmem %s265_s3, 512  ;;  %p372_p11 = scmp.lt.s32.totalorder %s265_s3, %s265_s3 }
  0x22   :  { %69 = vadd.xlane.f32.xlu0 %v68_v6  ;;  %72 = vadd.xlane.f32.xlu1 %v71_v7  ;;  %p368_p10 = scmp.ne.s32.totalorder %s265_s3, %s367_s29  ;;  %p373_p12 = scmp.lt.s32.totalorder %s367_s29, %s367_s29 }
  0x23   :  { %294 = vmatpush3.msra.mxu0 %v141_v29  ;;  %310 = vmatpush3.msra.mxu1 %v141_v29 }
  0x24   :  { %295 = vmatprep.subr.mxu0 %v140_v30  ;;  %307 = vmatprep.subr.mxu1 %v140_v30  ;;  %v136_v63 = vld [vmem:[#allocation2 + $0x8] sm:$0xff]  ;;  %p374_p13 = por %p373_p12, %p372_p11 }
  0x25   :  { %296 = vmatpush3.msra.mxu0 %v140_v30  ;;  %311 = vmatpush3.msra.mxu1 %v140_v30 }
  0x26   :  { %297 = vmatprep.subr.mxu0 %v139_v31  ;;  %308 = vmatprep.subr.mxu1 %v139_v31  ;;  %v138_v3 = vld [vmem:[#allocation2 + $0x18] sm:$0xff]  ;;  %v137_v7 = vld [vmem:[#allocation2 + $0x10] sm:$0xff]  ;;  %p375_p0 = pnand %p374_p13, %p368_p10 }
  0x27   :  { %298 = vmatpush3.msra.mxu0 %v139_v31  ;;  %312 = vmatpush3.msra.mxu1 %v139_v31 }
  0xa7   :  { %v64_v8 = vpop.xlane.xlu0 %63  ;;  %v67_v9 = vpop.xlane.xlu1 %66 }
  0xa8   :  { %v75_v10 = vmul.f32 0.03125, %v64_v8  ;;  %v76_v11 = vmul.f32 0.03125, %v67_v9 }
  0xaa   :  { %v440_v12 = vsub.f32 %v55_v0, %v75_v10  ;;  %v442_v13 = vsub.f32 %v56_v1, %v76_v11  ;;  %v135_v1 = vld [vmem:[#allocation2] sm:$0xff] }
  0xab   :  { %v70_v14 = vpop.xlane.xlu0 %69  ;;  %v73_v15 = vpop.xlane.xlu1 %72 }
  0xac   :  { %v77_v16 = vmul.f32 0.03125, %v70_v14  ;;  %v78_v17 = vmul.f32 0.03125, %v73_v15  ;;  %v83_v18 = vmul.f32 %v440_v12, %v440_v12  ;;  %v84_v19 = vmul.f32 %v442_v13, %v442_v13 }
  0xae   :  { %v81_v20 = vsub.f32 %v57_v2, %v77_v16  ;;  %v448_v21 = vsub.f32 %v58_v5, %v78_v17  ;;  %v87_v22 = vsel %vm50_vm0, %v83_v18, 0.0  ;;  %v90_v23 = vsel %vm50_vm0, %v84_v19, 0.0 }
  0xaf   :  { %88 = vadd.xlane.f32.xlu0 %v87_v22 }
  0xb0   :  { %v85_v24 = vmul.f32 %v81_v20, %v81_v20  ;;  %v86_v25 = vmul.f32 %v448_v21, %v448_v21 }
  0xb2   :  { %v93_v26 = vsel %vm50_vm0, %v85_v24, 0.0  ;;  %v96_v27 = vsel %vm50_vm0, %v86_v25, 0.0 }
  0xb3   :  { %91 = vadd.xlane.f32.xlu0 %v90_v23  ;;  %94 = vadd.xlane.f32.xlu1 %v93_v26 }
  0xb7   :  { %97 = vadd.xlane.f32.xlu1 %v96_v27 }
 0x138   :  { %v89_v33 = vpop.xlane.xlu0 %88 }
 0x139   :  { %v99_v34 = vmul.f32 0.03125, %v89_v33 }
 0x13b   :  { %v103_v35 = vadd.f32 1e-05, %v99_v34 }
 0x13c   :  { %v95_v36 = vpop.xlane.xlu1 %94  ;;  %v92_v37 = vpop.xlane.xlu0 %91 }
 0x13d   :  { %319 = vrsqrt.f32 %v103_v35  ;;  %v101_v38 = vmul.f32 0.03125, %v95_v36  ;;  %v100_v39 = vmul.f32 0.03125, %v92_v37 }
 0x13f   :  { %v105_v40 = vadd.f32 1e-05, %v101_v38  ;;  %v104_v41 = vadd.f32 1e-05, %v100_v39 }
 0x140   :  { %v98_v42 = vpop.xlane.xlu1 %97 }
 0x141   :  { %321 = vrsqrt.f32 %v105_v40  ;;  %v102_v43 = vmul.f32 0.03125, %v98_v42 }
 0x142   :  { %323 = vrsqrt.f32 %v104_v41 }
 0x143   :  { %v106_v44 = vadd.f32 1e-05, %v102_v43 }
 0x145   :  { %325 = vrsqrt.f32 %v106_v44 }
 0x14a   :  { %v320_v45 = vpop.eup %319 }
 0x14b   :  { %v111_v47 = vmul.f32 %v320_v45, %v440_v12 }
 0x14d   :  { %v121_v49 = vmul.f32 %v277_v46, %v111_v47 }
 0x14e   :  { %v322_v50 = vpop.eup %321 }
 0x14f   :  { %v324_v51 = vpop.eup %323  ;;  %v131_v52 = vadd.f32 %v278_v48, %v121_v49  ;;  %v113_v53 = vmul.f32 %v322_v50, %v81_v20 }
 0x150   :  { %v112_v54 = vmul.f32 %v324_v51, %v442_v13 }
 0x151   :  { %299 = vmatprep.mubr.msk.f32.mxu0 %vm50_vm0, %v131_v52  ;;  %v123_v55 = vmul.f32 %v277_v46, %v113_v53 }
 0x152   :  { %v326_v56 = vpop.eup %325  ;;  %v122_v57 = vmul.f32 %v277_v46, %v112_v54 }
 0x153   :  { %v133_v58 = vadd.f32 %v278_v48, %v123_v55  ;;  %v114_v59 = vmul.f32 %v326_v56, %v448_v21 }
 0x154   :  { %v132_v60 = vadd.f32 %v278_v48, %v122_v57 }
 0x155   :  { %302 = vmatprep.mubr.msk.f32.mxu1 %vm50_vm0, %v133_v58  ;;  %v124_v61 = vmul.f32 %v277_v46, %v114_v59 }
 0x156   :  { %300 = vmatmul.mubr.msk.f32.vlgmr.msra.gmra.mxu0 %vm50_vm0, %v132_v60 }
 0x157   :  { %v134_v62 = vadd.f32 %v278_v48, %v124_v61 }
 0x159   :  { %303 = vmatmul.mubr.msk.f32.vlgmr.msra.gmra.mxu1 %vm50_vm0, %v134_v62 }
 0x216   :  { %v301_v0 = vpop.f32.mrf.mxu0 }
 0x217   :  { %v241_v2 = vadd.f32 %v301_v0, %v136_v63 }
 0x218   :  { %v221_v4 = vpop.f32.mrf.mxu0 }
 0x219   :  { %245 = vst.msk [vmem:[#allocation2 + $0x8] sm:$0xff] %vm50_vm0, %v241_v2  ;;  %v240_v5 = vadd.f32 %v221_v4, %v135_v1  ;;  %v304_v6 = vpop.f32.mrf.mxu1 }
 0x21a   :  { %v243_v8 = vadd.f32 %v304_v6, %v138_v3 }
 0x21b   :  { %244 = vst.msk [vmem:[#allocation2] sm:$0xff] %vm50_vm0, %v240_v5  ;;  %v231_v9 = vpop.f32.mrf.mxu1 }
 0x21c   :  { %247 = vst.msk [vmem:[#allocation2 + $0x18] sm:$0xff] %vm50_vm0, %v243_v8  ;;  %v242_v10 = vadd.f32 %v231_v9, %v137_v7 }
 0x21e   :  { %246 = vst.msk [vmem:[#allocation2 + $0x10] sm:$0xff] %vm50_vm0, %v242_v10 }
 0x220   :  { %v252_v11 = vld [vmem:[#allocation2 + $0x8] sm:$0xff] }
 0x221   :  { %256 = vst.msk [vmem:[#allocation8 + $0x8] sm:$0xff] %vm50_vm0, %v252_v11 }
 0x222   :  { %v251_v12 = vld [vmem:[#allocation2] sm:$0xff] }
 0x223   :  { %v254_v13 = vld [vmem:[#allocation2 + $0x18] sm:$0xff]  ;;  %255 = vst.msk [vmem:[#allocation8] sm:$0xff] %vm50_vm0, %v251_v12 }
 0x224   :  { %258 = vst.msk [vmem:[#allocation8 + $0x18] sm:$0xff] %vm50_vm0, %v254_v13 }
 0x225   :  { %v253_v14 = vld [vmem:[#allocation2 + $0x10] sm:$0xff] }
 0x226   :  { %257 = vst.msk [vmem:[#allocation8 + $0x10] sm:$0xff] %vm50_vm0, %v253_v14 }
 0x227   :  { %378 = shalt.err (!%p375_p0)
}
 0x228   :  { %270 = dma.vmem_to_hbm [thread:$0]  %s265_s3, 512, %s491_s4, [#allocation5], %s394_s18, %s394_s18, %s395_s19  }
 0x229   :  { %391 = dma.done.wait [#allocation5], 512  }
 0x22a   :  { %392 = vsyncadd [#allocation5], 4294966784 }
 0x22b   :  { %274 = vsyncpa [#allocation4], 1 }
 0x22c   :  { %275 = vsyncpa [#allocation7], 1 }
 0x22d   :  { %276 = vsyncpa [#allocation5], 1 }

</bundles_post_ra>
